<compile_context>
chip_gen: v7x
topology: tpu7x:2x2x1
jax: 0.10.0
libtpu: 0.0.40
codegen_flags: <defaults>
</compile_context>

<pallas_src>
import jax
import jax.numpy as jnp
from jax.experimental import pallas as pl
from jax.experimental.pallas import tpu as pltpu


_LANE_CANDIDATES = (1024, 512, 256, 128)
_TARGET_BLOCK_BYTES = 2 * 1024 * 1024      # ~2 MiB per block -> 8 MiB live (in+out, 2x buffered)
_SMALL_FULL_BLOCK_BYTES = 2 * 1024 * 1024  # non-128-divisible leaves up to this run as one full block


# ---------------------------------------------------------------------------
# Kernel
# ---------------------------------------------------------------------------
def _make_elementwise_kernel(transform_fn):
    def kernel(x_ref, o_ref):
        o_ref[...] = transform_fn(x_ref[...]).astype(o_ref.dtype)

    return kernel


def _default_invert(x):
    """Dtype-aware stand-in for the abstract `_transform` (RandomInvert-style)."""
    if jnp.issubdtype(x.dtype, jnp.floating):
        return jnp.asarray(1.0, x.dtype) - x
    if jnp.issubdtype(x.dtype, jnp.integer):
        bound = jnp.iinfo(x.dtype).max
        # compute in int32 so narrow int dtypes lower cleanly; cast back at the store
        return jnp.asarray(bound, jnp.int32) - x.astype(jnp.int32)
    return x  # bool / other dtypes: identity copy


class RandomApplyTransformPallas:
    """Pallas port of `_RandomApplyTransform`.

    With probability `p` the (subclass-provided) `_transform` is applied to every
    tensor leaf of the input pytree; otherwise inputs pass through unchanged.
    """

    # TODO(synk): `_transform` is abstract in `_RandomApplyTransform`; concrete
    # subclasses override it. We use a dtype-aware elementwise invert as a
    # representative stand-in; pass `transform_fn` to select subclass behaviour.
    def __init__(self, p: float = 0.5, transform_fn=None):
        if not 0.0 <= p <= 1.0:
            raise ValueError(
                "`p` should be a floating point value in the interval [0.0, 1.0]."
            )
        self.p = float(p)
        self._transform_fn = transform_fn if transform_fn is not None else _default_invert
        self._kernel = _make_elementwise_kernel(self._transform_fn)

    # -- one tiled, lane-dense pallas_call over a 2-D view --------------------
    def _call_kernel_2d(self, x2d, tile_rows, num_tiles):
        rows, lane = x2d.shape
        return pl.pallas_call(
            self._kernel,
            out_shape=jax.ShapeDtypeStruct((rows, lane), x2d.dtype),
            grid=(num_tiles,),
            in_specs=[pl.BlockSpec((tile_rows, lane), lambda i: (i, 0))],
            out_specs=pl.BlockSpec((tile_rows, lane), lambda i: (i, 0)),
            compiler_params=pltpu.CompilerParams(
                dimension_semantics=("parallel",),
            ),
        )(x2d)

    @staticmethod
    def _tile_rows(rows, lane, itemsize):
        # Keep each block ~2 MiB regardless of dtype; round to a multiple of 32
        # (covers f32/bf16/int8 sublane packing).
        tile_rows_max = max(32, (_TARGET_BLOCK_BYTES // (lane * itemsize)) // 32 * 32)
        if rows > tile_rows_max:
            return tile_rows_max, pl.cdiv(rows, tile_rows_max)
        if rows >= 64:
            # v7x: keep >= 2 grid steps so "parallel" shards across both TensorCores.
            tile_rows = ((pl.cdiv(rows, 2) + 31) // 32) * 32
            return tile_rows, pl.cdiv(rows, tile_rows)
        # Small leaf: single full-extent rows block (no sublane-multiple constraint).
        return rows, 1

    def _run_leaf(self, leaf):
        total = leaf.size
        itemsize = jnp.dtype(leaf.dtype).itemsize
        flat = leaf.reshape(-1)  # bitcast-style reshape, no data movement

        lane = next((c for c in _LANE_CANDIDATES if total % c == 0), None)

        if lane is None:
            if total * itemsize <= _SMALL_FULL_BLOCK_BYTES:
                # One full-extent block: (1, total) block == full array dims is legal
                # regardless of the (8, 128) constraint.
                out = self._call_kernel_2d(flat.reshape(1, total), 1, 1)
                return out.reshape(leaf.shape)
            # TODO(synk): rare path — large leaf whose size is not a multiple of 128;
            # fall back to padding (one extra read+write of this leaf only).
            lane = 128
            rows = pl.cdiv(total, lane)
            flat = jnp.pad(flat, (0, rows * lane - total))
            tile_rows, num_tiles = self._tile_rows(rows, lane, itemsize)
            out = self._call_kernel_2d(flat.reshape(rows, lane), tile_rows, num_tiles)
            return out.reshape(-1)[:total].reshape(leaf.shape)

        rows = total // lane
        tile_rows, num_tiles = self._tile_rows(rows, lane, itemsize)
        out = self._call_kernel_2d(flat.reshape(rows, lane), tile_rows, num_tiles)
        return out.reshape(leaf.shape)

    # -- forward --------------------------------------------------------------
    def forward(self, *inputs, key=None, seed: int = 0):
        inputs = inputs if len(inputs) > 1 else inputs[0]
        flat, treedef = jax.tree_util.tree_flatten(inputs)

        arr_idx = [
            i for i, leaf in enumerate(flat)
            if isinstance(leaf, jax.Array) and leaf.size > 0
        ]
        if not arr_idx:
            return inputs

        if key is None:
            key = jax.random.PRNGKey(seed)
        r = jax.random.uniform(key, (), dtype=jnp.float32)
        apply = r < jnp.float32(self.p)        # torch: skip iff rand >= p

        arr_leaves = tuple(flat[i] for i in arr_idx)

        def apply_branch(leaves):
            return tuple(self._run_leaf(leaf) for leaf in leaves)

        def skip_branch(leaves):
            return tuple(leaves)

        # Eager: branch in Python so the skip path issues zero device work.
        # Traced (jit): lax.cond keeps both paths and decides at runtime.
        try:
            apply_concrete = bool(apply)
        except (jax.errors.ConcretizationTypeError, jax.errors.TracerBoolConversionError):
            apply_concrete = None

        if apply_concrete is None:
            out_leaves = jax.lax.cond(apply, apply_branch, skip_branch, arr_leaves)
        elif apply_concrete:
            out_leaves = apply_branch(arr_leaves)
        else:
            out_leaves = skip_branch(arr_leaves)

        flat_out = list(flat)
        for i, o in zip(arr_idx, out_leaves):
            flat_out[i] = o
        return jax.tree_util.tree_unflatten(treedef, flat_out)

    __call__ = forward


if __name__ == "__main__":
    key = jax.random.PRNGKey(0)
    x = jax.random.uniform(key, (2, 4, 16, 16), dtype=jnp.float32)

    # p in (0,1): gate decided by the random draw outside the kernel.
    transform = RandomApplyTransformPallas(p=0.5)
    out = jax.block_until_ready(transform(x, seed=0))
    assert out.shape == x.shape and out.dtype == x.dtype
    assert bool(jnp.allclose(out, x)) or bool(jnp.allclose(out, 1.0 - x, atol=1e-6))

    # p = 1.0 -> always apply; p = 0.0 -> never apply.
    out_always = jax.block_until_ready(RandomApplyTransformPallas(p=1.0)(x, seed=7))
    out_never = jax.block_until_ready(RandomApplyTransformPallas(p=0.0)(x, seed=7))
    assert jnp.allclose(out_always, 1.0 - x, atol=1e-6)
    assert jnp.allclose(out_never, x)

    # Pytree with multiple leaves, including an integer (uint8) mask.
    mask = jnp.full((2, 1, 16, 16), 100, jnp.uint8)
    tree = {"img": x, "mask": mask}
    tree_out = jax.block_until_ready(RandomApplyTransformPallas(p=1.0)(tree, seed=3))
    assert jnp.allclose(tree_out["img"], 1.0 - x, atol=1e-6)
    assert bool(jnp.all(tree_out["mask"] == jnp.uint8(155)))

    # Odd-sized leaf (not a multiple of 128) -> single full-extent block, no padding.
    x_odd = jnp.linspace(0.0, 1.0, 999, dtype=jnp.float32)
    out_odd = jax.block_until_ready(RandomApplyTransformPallas(p=1.0)(x_odd, seed=1))
    assert jnp.allclose(out_odd, 1.0 - x_odd, atol=1e-6)

    # Mid-size leaf exercising the >=2-grid-step split with a masked partial tail block.
    x_big = jax.random.uniform(jax.random.PRNGKey(1), (100, 1024), dtype=jnp.float32)
    out_big = jax.block_until_ready(RandomApplyTransformPallas(p=1.0)(x_big, seed=2))
    assert jnp.allclose(out_big, 1.0 - x_big, atol=1e-6)

    # jit path: key passed as a traced argument -> lax.cond around the pallas_call.
    t1 = RandomApplyTransformPallas(p=1.0)
    jit_out = jax.block_until_ready(
        jax.jit(lambda a, k: t1(a, key=k))(x, jax.random.PRNGKey(7))
    )
    assert jnp.allclose(jit_out, 1.0 - x, atol=1e-6)

    print("KERNEL_OK")
</pallas_src>

<mosaic_0001>
module attributes {stable_mosaic.version = 11 : i64} {
  func.func @kernel(%arg0: i32, %arg1: memref<2x1024xf32, #tpu.memory_space<vmem>>, %arg2: memref<2x1024xf32, #tpu.memory_space<vmem>>) attributes {dimension_semantics = [#tpu.dimension_semantics<parallel>], iteration_bounds = array<i64: 1>, scalar_prefetch = 0 : i64, scratch_operands = 0 : i64, tpu.core_type = #tpu.core_type<tc>, window_params = [{transform_indices = @transform_0, window_bounds = array<i64: 2, 1024>}, {transform_indices = @transform_1, window_bounds = array<i64: 2, 1024>}]} {
    %c0 = arith.constant 0 : index
    %c0_0 = arith.constant 0 : index
    %0 = vector.load %arg1[%c0, %c0_0] : memref<2x1024xf32, #tpu.memory_space<vmem>>, vector<2x1024xf32>
    %cst = arith.constant 1.000000e+00 : f32
    %1 = vector.broadcast %cst : f32 to vector<2x1024xf32>
    %2 = arith.subf %1, %0 : vector<2x1024xf32>
    %c0_1 = arith.constant 0 : index
    %c0_2 = arith.constant 0 : index
    %3 = vector.load %arg2[%c0_1, %c0_2] : memref<2x1024xf32, #tpu.memory_space<vmem>>, vector<2x1024xf32>
    tpu.vector_store %arg2[%c0_1, %c0_2], %2 {strides = array<i32>} : memref<2x1024xf32, #tpu.memory_space<vmem>>, vector<2x1024xf32>,
    return
  }
  func.func @transform_0(%arg0: i32) -> (i32, i32) {
    %c0_i32 = arith.constant 0 : i32
    %c0_i32_0 = arith.constant 0 : i32
    return %arg0, %c0_i32 : i32, i32
  }
  func.func @transform_1(%arg0: i32) -> (i32, i32) {
    %c0_i32 = arith.constant 0 : i32
    %c0_i32_0 = arith.constant 0 : i32
    return %arg0, %c0_i32 : i32, i32
  }
}

</mosaic_0001>

<bundles_post_ra>
// kernel: tpu_custom_call.1
= control target key start
LH: loop header
LB: loop body
LE: loop exit
PB: predicated region body
PF: predicated region fallthrough
CT: control target
= control target key end

     0   :  { %6 = vsyncpa [#allocation3], 0  ;;  %s128_s0 = inlined_call_operand.hbm [shape: f32[2,1024], index: 0, kind: input, shape index: {}]   ;;  %s129_s1 = inlined_call_operand.hbm [shape: f32[2,1024], index: 1, kind: output, shape index: {}]  }
   0x1   :  { %7 = vsyncpa [#allocation4], 0  ;;  %s92_s6 = smov [#allocation2]   ;;  %s44_s10 = scalar_lea.hbm %s128_s0, 256 }
   0x2   :  { %s14_s7 = sshll.u32 %s92_s6, 4  ;;  %p45_p0 = scmp.ne.s32.totalorder %s128_s0, %s44_s10  ;;  %s15_s7 = int_to_ptr.vmem [resolvable:$true] %s14_s7 }
   0x3   :  { %p48_p1 = scmp.lt.u32.totalorder %s44_s10, %s128_s0 }
   0x5   :  { %p50_p2 = pnand %p48_p1, %p45_p0 }
   0x7   :  { %53 = shalt.err (!%p50_p2)
}
   0x8   :  { %s54_s15 = scalar_lea.vmem %s15_s7, 256  ;;  %p59_p4 = scmp.lt.s32.totalorder %s15_s7, %s15_s7 }
   0x9   :  { %p55_p3 = scmp.ne.s32.totalorder %s15_s7, %s54_s15  ;;  %p60_p5 = scmp.lt.s32.totalorder %s54_s15, %s54_s15 }
   0xb   :  { %p61_p6 = por %p60_p5, %p59_p4 }
   0xd   :  { %p62_p7 = pnand %p61_p6, %p55_p3 }
   0xf   :  { %65 = shalt.err (!%p62_p7)
}
  0x10   :  { %17 = dma.hbm_to_vmem [thread:$0]  %s128_s0, 256, %s15_s7, [#allocation3]  }
  0x11   :  { %88 = dma.done.wait [#allocation3], 256  }
  0x12   :  { %89 = vsyncadd [#allocation3], 4294967040  ;;  %s93_s18 = smov [#allocation5]   ;;  %v21_v0 = vld [vmem:[#allocation2] sm:$0xff]  ;;  %v22_v1 = vld [vmem:[#allocation2 + $0x8] sm:$0xff] }
  0x13   :  { %s33_s19 = sshll.u32 %s93_s18, 4  ;;  %v23_v2 = vsub.f32 1.0, %v21_v0  ;;  %v24_v3 = vsub.f32 1.0, %v22_v1  ;;  %s34_s19 = int_to_ptr.vmem [resolvable:$true] %s33_s19 }
  0x14   :  { %s66_s20 = scalar_lea.vmem %s34_s19, 256  ;;  %p71_p9 = scmp.lt.s32.totalorder %s34_s19, %s34_s19 }
  0x15   :  { %25 = vst [vmem:[#allocation5] sm:$0xff] %v23_v2  ;;  %26 = vst [vmem:[#allocation5 + $0x8] sm:$0xff] %v24_v3  ;;  %p67_p8 = scmp.ne.s32.totalorder %s34_s19, %s66_s20  ;;  %p72_p10 = scmp.lt.s32.totalorder %s66_s20, %s66_s20 }
  0x17   :  { %p73_p11 = por %p72_p10, %p71_p9 }
  0x19   :  { %p74_p12 = pnand %p73_p11, %p67_p8 }
  0x1b   :  { %77 = shalt.err (!%p74_p12)
}
  0x1c   :  { %s78_s22 = scalar_lea.hbm %s129_s1, 256 }
  0x1d   :  { %p79_p13 = scmp.ne.s32.totalorder %s129_s1, %s78_s22  ;;  %p82_p0 = scmp.lt.u32.totalorder %s78_s22, %s129_s1 }
  0x1f   :  { %p84_p1 = pnand %p82_p0, %p79_p13 }
  0x21   :  { %87 = shalt.err (!%p84_p1)
}
  0x22   :  { %36 = dma.vmem_to_hbm [thread:$0]  %s34_s19, 256, %s129_s1, [#allocation4]  }
  0x23   :  { %90 = dma.done.wait [#allocation4], 256  }
  0x24   :  { %91 = vsyncadd [#allocation4], 4294967040 }
  0x25   :  { %40 = vsyncpa [#allocation3], 1 }
  0x26   :  { %41 = vsyncpa [#allocation4], 1 }

</bundles_post_ra>
